<compile_context>
chip_gen: v5e
topology: v5e:2x2
jax: 0.10.0
libtpu: 0.0.40
codegen_flags: <defaults>
</compile_context>

<pallas_src>
import functools

import jax
import jax.numpy as jnp
from jax.experimental import pallas as pl
from jax.experimental.pallas import tpu as pltpu


def _round_up(x, m):
    return (x + m - 1) // m * m


def _cdiv(a, b):
    return -(-a // b)


def _device_kind():
    try:
        return jax.devices()[0].device_kind.lower()
    except Exception:
        return ""


def _default_tm():
    kind = _device_kind()
    if "v5" in kind:
        return 256    # roofline ~240 flops/byte already met; bigger only burns VMEM
    if "v7" in kind:
        return 512    # ~310 flops/byte needed; 1024-tall tiles would not fit 64 MiB VMEM
    if "v6" in kind:
        return 1024   # ~650 flops/byte needed; fits 128 MiB VMEM
    return 512


# ---------------------------------------------------------------------------
# One-time weight preparation (do NOT call per forward pass).
# ---------------------------------------------------------------------------
def prepare_qwen2_mlp_weights(w_gate, w_up, w_down, *, tI=None):
    """Pack gate/up/down weights for the streaming kernel.

    w_gate, w_up: (H, I) transposed nn.Linear weights; w_down: (I, H).
    Returns (wgu, wd) where
      wgu: (nK, H, 2*tI)  chunk k = [gate[:, k*tI:(k+1)*tI] | up[:, k*tI:(k+1)*tI]]
      wd:  (nK, tI, H)    chunk k = down[k*tI:(k+1)*tI, :]
    I is zero-padded to a multiple of tI; padded columns produce exactly 0.
    """
    H, I = w_gate.shape
    assert w_up.shape == (H, I) and w_down.shape == (I, H)
    if tI is None:
        # 256-aligned chunk (256-deep MXU on v6e/v7x, lane-aligned split),
        # capped at 2048 so per-step weight tiles stay a few MiB.
        tI = min(_round_up(I, 256), 2048)
    assert tI % 256 == 0, "tI must be a multiple of 256 (lane/MXU alignment)"
    I_pad = _round_up(I, tI)
    if I_pad != I:
        pad = I_pad - I
        w_gate = jnp.pad(w_gate, ((0, 0), (0, pad)))
        w_up = jnp.pad(w_up, ((0, 0), (0, pad)))
        w_down = jnp.pad(w_down, ((0, pad), (0, 0)))
    nK = I_pad // tI
    wgu = jnp.concatenate(
        [w_gate.reshape(H, nK, tI), w_up.reshape(H, nK, tI)], axis=-1
    )                                   # (H, nK, 2*tI)
    wgu = jnp.transpose(wgu, (1, 0, 2))  # (nK, H, 2*tI) -> contiguous per-chunk DMA
    wd = w_down.reshape(nK, tI, H)       # (nK, tI, H)   -> contiguous per-chunk DMA
    # TODO(synk): for HBM-bound decode, store wgu/wd in fp8 (v7x) / int8 (v6e)
    # to halve streamed weight bytes.
    return wgu, wd


# ---------------------------------------------------------------------------
# Kernel
# ---------------------------------------------------------------------------
def _swiglu_mlp_kernel(x_ref, wgu_ref, wd_ref, o_ref, acc_ref, *, tI):
    # x_ref:   (tm, H)      activation row tile (resident across k)
    # wgu_ref: (H, 2*tI)    fused [gate | up] weight chunk k
    # wd_ref:  (tI, H)      down_proj weight chunk k
    # o_ref:   (tm, H)      output row tile (written on last k)
    # acc_ref: (tm, H) f32  accumulator scratch (persists across k)
    k = pl.program_id(1)

    @pl.when(k == 0)
    def _init():
        acc_ref[...] = jnp.zeros_like(acc_ref)

    x = x_ref[...]
    # One wide MXU pass for gate+up, f32 accumulation.
    gu = jnp.dot(x, wgu_ref[...], preferred_element_type=jnp.float32)  # (tm, 2*tI)
    g = gu[:, :tI]
    u = gu[:, tI:]
    h = (g * jax.nn.sigmoid(g)) * u  # SiLU(gate) * up, in f32

    # Partial down_proj for this I-chunk; accumulate in f32.
    acc_ref[...] += jnp.dot(h.astype(wd_ref.dtype), wd_ref[...],
                            preferred_element_type=jnp.float32)

    @pl.when(k == pl.num_programs(1) - 1)
    def _finalize():
        o_ref[...] = acc_ref[...].astype(o_ref.dtype)


# ---------------------------------------------------------------------------
# Forward wrapper
# ---------------------------------------------------------------------------
def qwen2_mlp(x, wgu, wd, *, tm=None, vmem_limit_bytes=None):
    """SwiGLU MLP forward using pre-packed weights from prepare_qwen2_mlp_weights.

    x:   (..., H)
    wgu: (nK, H, 2*tI)
    wd:  (nK, tI, H)
    returns (..., H)
    """
    orig_shape = x.shape
    H = orig_shape[-1]
    nK, Hw, two_tI = wgu.shape
    tI = two_tI // 2
    assert Hw == H and wd.shape == (nK, tI, H)
    I_pad = nK * tI

    x2 = x.reshape(-1, H)
    S = x2.shape[0]

    # --- Row tile selection: per-chip max, then balance across tiles so the
    #     total padding is at most ~8 rows per tile (minimizes wasted MXU work).
    tm_max = _default_tm() if tm is None else tm
    tm_max = max(8, tm_max)
    nR = max(1, _cdiv(S, tm_max))
    tm = _round_up(_cdiv(S, nR), 8)
    S_pad = nR * tm
    if S_pad != S:
        x2 = jnp.pad(x2, ((0, S_pad - S), (0, 0)))

    # --- VMEM budget: double-buffered x / wgu / wd / out blocks + f32 scratch.
    if vmem_limit_bytes is None:
        xb = jnp.dtype(x.dtype).itemsize
        wb = jnp.dtype(wgu.dtype).itemsize
        footprint = (2 * tm * H * xb          # x blocks
                     + 2 * H * 2 * tI * wb    # wgu blocks
                     + 2 * tI * H * wb        # wd blocks
                     + 2 * tm * H * xb        # out blocks
                     + tm * H * 4)            # f32 accumulator
        try:
            vmem_cap = pltpu.get_tpu_info().vmem_capacity_bytes
        except Exception:
            vmem_cap = 128 << 20
        vmem_limit_bytes = min(int(footprint * 1.25) + (2 << 20), vmem_cap)

    # --- Advisory cost estimate (weights are re-streamed once per row tile).
    wbytes = (wgu.size * wgu.dtype.itemsize + wd.size * wd.dtype.itemsize)
    cost = pl.CostEstimate(
        flops=6 * S_pad * H * I_pad,
        transcendentals=S_pad * I_pad,
        bytes_accessed=int(x2.size * x2.dtype.itemsize          # activations in
                           + nR * wbytes                        # weights per row tile
                           + S_pad * H * x2.dtype.itemsize),    # output
    )

    # TODO(synk): for decode (nR == 1) on v7x, add a second parallel axis
    # (split H or k across the two TensorCores) so both cores stream weights.
    out = pl.pallas_call(
        functools.partial(_swiglu_mlp_kernel, tI=tI),
        out_shape=jax.ShapeDtypeStruct((S_pad, H), x.dtype),
        grid_spec=pltpu.PrefetchScalarGridSpec(
            num_scalar_prefetch=0,
            grid=(nR, nK),
            in_specs=[
                pl.BlockSpec((tm, H), lambda i, k: (i, 0)),          # activations
                pl.BlockSpec((None, H, 2 * tI), lambda i, k: (k, 0, 0)),  # gate|up chunk
                pl.BlockSpec((None, tI, H), lambda i, k: (k, 0, 0)),      # down chunk
            ],
            out_specs=pl.BlockSpec((tm, H), lambda i, k: (i, 0)),
            scratch_shapes=[pltpu.VMEM((tm, H), jnp.float32)],
        ),
        compiler_params=pltpu.CompilerParams(
            dimension_semantics=("parallel", "arbitrary"),
            vmem_limit_bytes=int(vmem_limit_bytes),
        ),
        cost_estimate=cost,
    )(x2, wgu, wd)

    if S_pad != S:
        out = out[:S]
    return out.reshape(orig_shape)


# ---------------------------------------------------------------------------
# Pure-JAX reference
# ---------------------------------------------------------------------------
def _reference(x, w_gate, w_up, w_down):
    xf = x.astype(jnp.float32)
    g = xf @ w_gate.astype(jnp.float32)
    u = xf @ w_up.astype(jnp.float32)
    return (jax.nn.silu(g) * u) @ w_down.astype(jnp.float32)


if __name__ == "__main__":
    key = jax.random.PRNGKey(0)

    # --- Test 1: f32, I not a multiple of tI (exercises I zero-padding + 2 k-steps)
    S, H, I = 8, 64, 384
    k1, k2, k3, k4, key = jax.random.split(key, 5)
    x = jax.random.normal(k1, (S, H), dtype=jnp.float32)
    wg = jax.random.normal(k2, (H, I), dtype=jnp.float32) * 0.05
    wu = jax.random.normal(k3, (H, I), dtype=jnp.float32) * 0.05
    wd = jax.random.normal(k4, (I, H), dtype=jnp.float32) * 0.05

    wgu_p, wd_p = prepare_qwen2_mlp_weights(wg, wu, wd, tI=256)  # one-time pack
    out = jax.block_until_ready(qwen2_mlp(x, wgu_p, wd_p))
    ref = _reference(x, wg, wu, wd)
    assert out.shape == (S, H)
    assert jnp.allclose(out, ref, atol=1e-4, rtol=1e-4), "f32 mismatch vs reference"

    # --- Test 2: bf16, 3-D input, ragged rows (exercises adaptive tm + row padding)
    B2, T2, H2, I2 = 2, 100, 128, 512
    k1, k2, k3, k4, key = jax.random.split(key, 5)
    x2 = jax.random.normal(k1, (B2, T2, H2), dtype=jnp.float32).astype(jnp.bfloat16)
    wg2 = (jax.random.normal(k2, (H2, I2), dtype=jnp.float32) * 0.05).astype(jnp.bfloat16)
    wu2 = (jax.random.normal(k3, (H2, I2), dtype=jnp.float32) * 0.05).astype(jnp.bfloat16)
    wd2 = (jax.random.normal(k4, (I2, H2), dtype=jnp.float32) * 0.05).astype(jnp.bfloat16)

    wgu2_p, wd2_p = prepare_qwen2_mlp_weights(wg2, wu2, wd2, tI=256)  # one-time pack
    out2 = jax.block_until_ready(qwen2_mlp(x2, wgu2_p, wd2_p))
    ref2 = _reference(x2.reshape(-1, H2), wg2, wu2, wd2).reshape(B2, T2, H2)
    assert out2.shape == (B2, T2, H2)
    assert jnp.allclose(out2.astype(jnp.float32), ref2, atol=5e-2, rtol=5e-2), \
        "bf16 mismatch vs reference"

    print("KERNEL_OK")
</pallas_src>

<mosaic_0001>
module attributes {stable_mosaic.version = 11 : i64} {
  func.func @_swiglu_mlp_kernel(%arg0: i32, %arg1: i32, %arg2: memref<8x64xf32, #tpu.memory_space<vmem>>, %arg3: memref<1x64x512xf32, #tpu.memory_space<vmem>>, %arg4: memref<1x256x64xf32, #tpu.memory_space<vmem>>, %arg5: memref<8x64xf32, #tpu.memory_space<vmem>>, %arg6: memref<8x64xf32, #tpu.memory_space<vmem>>) attributes {dimension_semantics = [#tpu.dimension_semantics<parallel>, #tpu.dimension_semantics<arbitrary>], iteration_bounds = array<i64: 1, 2>, scalar_prefetch = 0 : i64, scratch_operands = 1 : i64, tpu.core_type = #tpu.core_type<tc>, window_params = [{transform_indices = @transform_0, window_bounds = array<i64: 8, 64>}, {transform_indices = @transform_1, window_bounds = array<i64: 1, 64, 512>}, {transform_indices = @transform_2, window_bounds = array<i64: 1, 256, 64>}, {transform_indices = @transform_3, window_bounds = array<i64: 8, 64>}]} {
    %c0_i32 = arith.constant 0 : i32
    %0 = arith.cmpi eq, %arg1, %c0_i32 : i32
    %1 = arith.extui %0 : i1 to i32
    %c0_i32_0 = arith.constant 0 : i32
    %2 = arith.cmpi ne, %1, %c0_i32_0 : i32
    scf.if %2 {
      %cst_15 = arith.constant 0.000000e+00 : f32
      %25 = vector.broadcast %cst_15 : f32 to vector<8x64xf32>
      %c0_16 = arith.constant 0 : index
      %c0_17 = arith.constant 0 : index
      %26 = vector.load %arg6[%c0_16, %c0_17] : memref<8x64xf32, #tpu.memory_space<vmem>>, vector<8x64xf32>
      tpu.vector_store %arg6[%c0_16, %c0_17], %25 {strides = array<i32>} : memref<8x64xf32, #tpu.memory_space<vmem>>, vector<8x64xf32>,
    } else {
    }
    %c0 = arith.constant 0 : index
    %c0_1 = arith.constant 0 : index
    %3 = vector.load %arg2[%c0, %c0_1] : memref<8x64xf32, #tpu.memory_space<vmem>>, vector<8x64xf32>
    %c0_2 = arith.constant 0 : index
    %c0_3 = arith.constant 0 : index
    %c0_4 = arith.constant 0 : index
    %4 = vector.load %arg3[%c0_2, %c0_3, %c0_4] : memref<1x64x512xf32, #tpu.memory_space<vmem>>, vector<1x64x512xf32>
    %5 = vector.shape_cast %4 : vector<1x64x512xf32> to vector<64x512xf32>
    %cst = arith.constant dense<0.000000e+00> : vector<8x512xf32>
    %6 = tpu.matmul %3, %5, %cst {dimension_numbers = #tpu.dot_dimension_numbers<[1], [0], [0], [1], [0, 0, 1, 1], [], []>} : vector<8x64xf32>, vector<64x512xf32>, vector<8x512xf32> -> vector<8x512xf32>
    %7 = vector.extract_strided_slice %6 {offsets = [0, 0], sizes = [8, 256], strides = [1, 1]} : vector<8x512xf32> to vector<8x256xf32>
    %8 = vector.extract_strided_slice %6 {offsets = [0, 256], sizes = [8, 256], strides = [1, 1]} : vector<8x512xf32> to vector<8x256xf32>
    %9 = arith.negf %7 : vector<8x256xf32>
    %10 = math.exp %9 : vector<8x256xf32>
    %cst_5 = arith.constant 1.000000e+00 : f32
    %11 = vector.broadcast %cst_5 : f32 to vector<8x256xf32>
    %12 = arith.addf %11, %10 : vector<8x256xf32>
    %13 = arith.divf %11, %12 : vector<8x256xf32>
    %14 = arith.mulf %7, %13 : vector<8x256xf32>
    %15 = arith.mulf %14, %8 : vector<8x256xf32>
    %c0_6 = arith.constant 0 : index
    %c0_7 = arith.constant 0 : index
    %16 = vector.load %arg6[%c0_6, %c0_7] : memref<8x64xf32, #tpu.memory_space<vmem>>, vector<8x64xf32>
    %c0_8 = arith.constant 0 : index
    %c0_9 = arith.constant 0 : index
    %c0_10 = arith.constant 0 : index
    %17 = vector.load %arg4[%c0_8, %c0_9, %c0_10] : memref<1x256x64xf32, #tpu.memory_space<vmem>>, vector<1x256x64xf32>
    %18 = vector.shape_cast %17 : vector<1x256x64xf32> to vector<256x64xf32>
    %cst_11 = arith.constant dense<0.000000e+00> : vector<8x64xf32>
    %19 = tpu.matmul %15, %18, %cst_11 {dimension_numbers = #tpu.dot_dimension_numbers<[1], [0], [0], [1], [0, 0, 1, 1], [], []>} : vector<8x256xf32>, vector<256x64xf32>, vector<8x64xf32> -> vector<8x64xf32>
    %20 = arith.addf %16, %19 : vector<8x64xf32>
    %c0_12 = arith.constant 0 : index
    %c0_13 = arith.constant 0 : index
    %21 = vector.load %arg6[%c0_12, %c0_13] : memref<8x64xf32, #tpu.memory_space<vmem>>, vector<8x64xf32>
    tpu.vector_store %arg6[%c0_12, %c0_13], %20 {strides = array<i32>} : memref<8x64xf32, #tpu.memory_space<vmem>>, vector<8x64xf32>,
    %c1_i32 = arith.constant 1 : i32
    %22 = arith.cmpi eq, %arg1, %c1_i32 : i32
    %23 = arith.extui %22 : i1 to i32
    %c0_i32_14 = arith.constant 0 : i32
    %24 = arith.cmpi ne, %23, %c0_i32_14 : i32
    scf.if %24 {
      %c0_15 = arith.constant 0 : index
      %c0_16 = arith.constant 0 : index
      %25 = vector.load %arg6[%c0_15, %c0_16] : memref<8x64xf32, #tpu.memory_space<vmem>>, vector<8x64xf32>
      %c0_17 = arith.constant 0 : index
      %c0_18 = arith.constant 0 : index
      %26 = vector.load %arg5[%c0_17, %c0_18] : memref<8x64xf32, #tpu.memory_space<vmem>>, vector<8x64xf32>
      tpu.vector_store %arg5[%c0_17, %c0_18], %25 {strides = array<i32>} : memref<8x64xf32, #tpu.memory_space<vmem>>, vector<8x64xf32>,
    } else {
    }
    return
  }
  func.func @transform_0(%arg0: i32, %arg1: i32) -> (i32, i32) {
    %c0_i32 = arith.constant 0 : i32
    %c0_i32_0 = arith.constant 0 : i32
    return %arg0, %c0_i32 : i32, i32
  }
  func.func @transform_1(%arg0: i32, %arg1: i32) -> (i32, i32, i32) {
    %c0_i32 = arith.constant 0 : i32
    %c0_i32_0 = arith.constant 0 : i32
    %c0_i32_1 = arith.constant 0 : i32
    return %arg1, %c0_i32, %c0_i32_0 : i32, i32, i32
  }
  func.func @transform_2(%arg0: i32, %arg1: i32) -> (i32, i32, i32) {
    %c0_i32 = arith.constant 0 : i32
    %c0_i32_0 = arith.constant 0 : i32
    %c0_i32_1 = arith.constant 0 : i32
    return %arg1, %c0_i32, %c0_i32_0 : i32, i32, i32
  }
  func.func @transform_3(%arg0: i32, %arg1: i32) -> (i32, i32) {
    %c0_i32 = arith.constant 0 : i32
    %c0_i32_0 = arith.constant 0 : i32
    return %arg0, %c0_i32 : i32, i32
  }
}

</mosaic_0001>

<bundles_post_ra>
// kernel: tpu_custom_call.1
= control target key start
LH: loop header
LB: loop body
LE: loop exit
PB: predicated region body
PF: predicated region fallthrough
CT: control target
= control target key end

     0   :  { %8 = vsyncpa [#allocation4], 0  ;;  %s686_s12 = smov 0   ;;  %s688_s13 = smov 0   ;;  %s808_s0 = inlined_call_operand.vmem [shape: f32[8,64], index: 0, kind: input, shape index: {}]   ;;  %s809_s1 = inlined_call_operand.vmem [shape: f32[2,64,512], index: 1, kind: input, shape index: {}]   ;;  %s810_s2 = inlined_call_operand.vmem [shape: f32[2,256,64], index: 2, kind: input, shape index: {}]   ;;  %s811_s3 = inlined_call_operand.hbm [shape: f32[8,64], index: 3, kind: output, shape index: {}]  }
   0x1   :  { %s690_s14 = smov 0  }
   0x2 LB: > { %s545_s15 = sadd.s32 4294967295, %s662_s14   ;;  %s23_s16 = sadd.s32 1, %s658_s13  ;;  %s662_s14 = sphi %s690_s14, %s14_s14   ;;  %s658_s13 = sphi %s688_s13, %s813_s13   ;;  %s654_s12 = sphi %s686_s12, %s812_s12  }
   0x3   : > { %p24_p0 = scmp.ge.s32.totalorder %s23_s16, 2  ;;  %p549_p1 = scmp.ge.s32.totalorder %s662_s14, 1 }
   0x4   : > { %p169_p2 = scmp.lt.s32.totalorder %s662_s14, 3 }
   0x5   : > { %s815_s16 = smov (%p24_p0, %s23_s16), 0 }
   0x6   : > { %p170_p3 = pnand %p549_p1, %p169_p2 }
   0x7   : > { %p201_p4 = scmp.lt.s32.totalorder (!%p170_p3), %s654_s12, 1  ;;  %p554_p5 = scmp.ne.s32.totalorder (!%p170_p3), %s654_s12, 0 }
   0x8   : > { %173 = sbr.rel (%p170_p3) target bundleno = 347 (0x15b), region = 32 }
   0xd   : > { %s202_s17 = scalar_select %p201_p4, %s654_s12, 1 }
   0xe   : > { %214 = sbr.rel (%p554_p5) target bundleno = 21 (0x15), region = 36 }
   0xf   : > { %s566_s18 = sshll.u32 %s202_s17, 8 }
  0x10   : > { %s712_s21 = scalar_lea.vmem %s809_s1, %s566_s18  ;;  %s717_s24 = scalar_lea.vmem %s810_s2, %s566_s18 }
  0x13   : > { %vm215_vm0 = vcmask 523264   ;;  %v664_v0 = vmov 0.0  }
  0x14   : > { %216 = vst.msk [vmem:[#allocation2] sm:$0xff] %vm215_vm0, %v664_v0 }
  0x15 PF: > { %v246_v1 = vld [vmem:[%s712_s21 + $0xe0] sm:$0xff]  ;;  %v247_v2 = vld [vmem:[%s712_s21 + $0xe8] sm:$0xff]  ;;  %vm250_vm1 = vcmask 523264   ;;  %v248_v18 = vld [vmem:[%s712_s21 + $0xf0] sm:$0xff]  ;;  %p561_p6 = scmp.ne.s32.totalorder %s654_s12, 1 }
  0x16   : > { %v242_v3 = vld [vmem:[%s712_s21 + $0xc0] sm:$0xff]  ;;  %262 = vmatpush.msra.mxu2 %v246_v1  ;;  %282 = vmatpush.msra.mxu3 %v247_v2  ;;  %v243_v4 = vld [vmem:[%s712_s21 + $0xc8] sm:$0xff]  ;;  %v249_v19 = vld [vmem:[%s712_s21 + $0xf8] sm:$0xff] }
  0x17   : > { %v238_v5 = vld [vmem:[%s712_s21 + $0xa0] sm:$0xff]  ;;  %v239_v6 = vld [vmem:[%s712_s21 + $0xa8] sm:$0xff]  ;;  %v244_v20 = vld [vmem:[%s712_s21 + $0xd0] sm:$0xff] }
  0x18   : > { %263 = vmatpush.msra.mxu2 %v242_v3  ;;  %283 = vmatpush.msra.mxu3 %v243_v4  ;;  %v234_v7 = vld [vmem:[%s712_s21 + $0x80] sm:$0xff]  ;;  %v235_v8 = vld [vmem:[%s712_s21 + $0x88] sm:$0xff]  ;;  %v245_v21 = vld [vmem:[%s712_s21 + $0xd8] sm:$0xff] }
  0x19   : > { %v230_v9 = vld [vmem:[%s712_s21 + $0x60] sm:$0xff]  ;;  %v231_v10 = vld [vmem:[%s712_s21 + $0x68] sm:$0xff]  ;;  %v240_v22 = vld [vmem:[%s712_s21 + $0xb0] sm:$0xff] }
  0x1a   : > { %264 = vmatpush.msra.mxu2 %v238_v5  ;;  %284 = vmatpush.msra.mxu3 %v239_v6  ;;  %v226_v11 = vld [vmem:[%s712_s21 + $0x40] sm:$0xff]  ;;  %v227_v12 = vld [vmem:[%s712_s21 + $0x48] sm:$0xff]  ;;  %v241_v23 = vld [vmem:[%s712_s21 + $0xb8] sm:$0xff] }
  0x1b   : > { %v222_v13 = vld [vmem:[%s712_s21 + $0x20] sm:$0xff]  ;;  %v223_v14 = vld [vmem:[%s712_s21 + $0x28] sm:$0xff]  ;;  %v236_v24 = vld [vmem:[%s712_s21 + $0x90] sm:$0xff] }
  0x1c   : > { %265 = vmatpush.msra.mxu2 %v234_v7  ;;  %285 = vmatpush.msra.mxu3 %v235_v8  ;;  %v218_v15 = vld [vmem:[%s712_s21] sm:$0xff]  ;;  %v219_v16 = vld [vmem:[%s712_s21 + $0x8] sm:$0xff]  ;;  %v237_v25 = vld [vmem:[%s712_s21 + $0x98] sm:$0xff] }
  0x1d   : > { %v217_v17 = vld [vmem:[%s808_s0] sm:$0xff]  ;;  %v232_v26 = vld [vmem:[%s712_s21 + $0x70] sm:$0xff]  ;;  %v233_v27 = vld [vmem:[%s712_s21 + $0x78] sm:$0xff] }
  0x1e   : > { %266 = vmatpush.msra.mxu2 %v230_v9  ;;  %286 = vmatpush.msra.mxu3 %v231_v10  ;;  %v228_v28 = vld [vmem:[%s712_s21 + $0x50] sm:$0xff]  ;;  %v229_v29 = vld [vmem:[%s712_s21 + $0x58] sm:$0xff]  ;;  %v390_v38 = vld [vmem:[%s717_s24 + $0x68] sm:$0xff] }
  0x1f   : > { %v224_v30 = vld [vmem:[%s712_s21 + $0x30] sm:$0xff]  ;;  %v225_v31 = vld [vmem:[%s712_s21 + $0x38] sm:$0xff]  ;;  %v406_v39 = vld [vmem:[%s717_s24 + $0xe8] sm:$0xff] }
  0x20   : > { %267 = vmatpush.msra.mxu2 %v226_v11  ;;  %287 = vmatpush.msra.mxu3 %v227_v12  ;;  %v220_v32 = vld [vmem:[%s712_s21 + $0x10] sm:$0xff]  ;;  %v221_v33 = vld [vmem:[%s712_s21 + $0x18] sm:$0xff]  ;;  %v389_v40 = vld [vmem:[%s717_s24 + $0x60] sm:$0xff] }
  0x21   : > { %v392_v34 = vld [vmem:[%s717_s24 + $0x78] sm:$0xff]  ;;  %v391_v36 = vld [vmem:[%s717_s24 + $0x70] sm:$0xff]  ;;  %v405_v41 = vld [vmem:[%s717_s24 + $0xe0] sm:$0xff] }
  0x22   : > { %268 = vmatpush.msra.mxu2 %v222_v13  ;;  %288 = vmatpush.msra.mxu3 %v223_v14  ;;  %v408_v35 = vld [vmem:[%s717_s24 + $0xf8] sm:$0xff]  ;;  %v407_v37 = vld [vmem:[%s717_s24 + $0xf0] sm:$0xff]  ;;  %v386_v46 = vld [vmem:[%s717_s24 + $0x48] sm:$0xff] }
  0x23   : > { %409 = vmatpush.msra.mxu0 %v392_v34  ;;  %429 = vmatpush.msra.mxu1 %v408_v35  ;;  %v388_v42 = vld [vmem:[%s717_s24 + $0x58] sm:$0xff]  ;;  %v387_v44 = vld [vmem:[%s717_s24 + $0x50] sm:$0xff]  ;;  %v402_v47 = vld [vmem:[%s717_s24 + $0xc8] sm:$0xff] }
  0x24   : > { %269 = vmatpush.msra.mxu2 %v218_v15  ;;  %289 = vmatpush.msra.mxu3 %v219_v16  ;;  %v404_v43 = vld [vmem:[%s717_s24 + $0xd8] sm:$0xff]  ;;  %v403_v45 = vld [vmem:[%s717_s24 + $0xd0] sm:$0xff]  ;;  %v385_v48 = vld [vmem:[%s717_s24 + $0x40] sm:$0xff] }
  0x25   : > { %555 = vmatmul.msk.f32.vlgmr.msra.gmra.mxu2 %vm250_vm1, %v217_v17  ;;  %556 = vmatmul.msk.f32.vlgmr.msra.gmra.mxu3 %vm250_vm1, %v217_v17  ;;  %v401_v49 = vld [vmem:[%s717_s24 + $0xc0] sm:$0xff]  ;;  %v384_v50 = vld [vmem:[%s717_s24 + $0x38] sm:$0xff]  ;;  %v383_v52 = vld [vmem:[%s717_s24 + $0x30] sm:$0xff] }
  0x26   : > { %302 = vmatpush.msrb.mxu2 %v248_v18  ;;  %322 = vmatpush.msrb.mxu3 %v249_v19  ;;  %v400_v51 = vld [vmem:[%s717_s24 + $0xb8] sm:$0xff]  ;;  %v399_v53 = vld [vmem:[%s717_s24 + $0xb0] sm:$0xff]  ;;  %v382_v54 = vld [vmem:[%s717_s24 + $0x28] sm:$0xff] }
  0x27   : > { %410 = vmatpush.msra.mxu0 %v391_v36  ;;  %430 = vmatpush.msra.mxu1 %v407_v37  ;;  %v398_v55 = vld [vmem:[%s717_s24 + $0xa8] sm:$0xff]  ;;  %v381_v56 = vld [vmem:[%s717_s24 + $0x20] sm:$0xff]  ;;  %v380_v58 = vld [vmem:[%s717_s24 + $0x18] sm:$0xff] }
  0x28   : > { %303 = vmatpush.msrb.mxu2 %v244_v20  ;;  %323 = vmatpush.msrb.mxu3 %v245_v21  ;;  %v397_v57 = vld [vmem:[%s717_s24 + $0xa0] sm:$0xff]  ;;  %v396_v59 = vld [vmem:[%s717_s24 + $0x98] sm:$0xff]  ;;  %v379_v60 = vld [vmem:[%s717_s24 + $0x10] sm:$0xff] }
  0x29   : > { %411 = vmatpush.msra.mxu0 %v390_v38  ;;  %431 = vmatpush.msra.mxu1 %v406_v39  ;;  %v395_v61 = vld [vmem:[%s717_s24 + $0x90] sm:$0xff]  ;;  %v378_v62 = vld [vmem:[%s717_s24 + $0x8] sm:$0xff]  ;;  %v377_v2 = vld [vmem:[%s717_s24] sm:$0xff] }
  0x2a   : > { %304 = vmatpush.msrb.mxu2 %v240_v22  ;;  %324 = vmatpush.msrb.mxu3 %v241_v23  ;;  %v394_v63 = vld [vmem:[%s717_s24 + $0x88] sm:$0xff]  ;;  %v393_v3 = vld [vmem:[%s717_s24 + $0x80] sm:$0xff] }
  0x2b   : > { %412 = vmatpush.msra.mxu0 %v389_v40  ;;  %432 = vmatpush.msra.mxu1 %v405_v41  ;;  %v376_v37 = vld [vmem:[#allocation2] sm:$0xff] }
  0x2c   : > { %305 = vmatpush.msrb.mxu2 %v236_v24  ;;  %325 = vmatpush.msrb.mxu3 %v237_v25 }
  0x2d   : > { %413 = vmatpush.msra.mxu0 %v388_v42  ;;  %433 = vmatpush.msra.mxu1 %v404_v43 }
  0x2e   : > { %306 = vmatpush.msrb.mxu2 %v232_v26  ;;  %326 = vmatpush.msrb.mxu3 %v233_v27 }
  0x2f   : > { %414 = vmatpush.msra.mxu0 %v387_v44  ;;  %434 = vmatpush.msra.mxu1 %v403_v45 }
  0x30   : > { %307 = vmatpush.msrb.mxu2 %v228_v28  ;;  %327 = vmatpush.msrb.mxu3 %v229_v29 }
  0x31   : > { %415 = vmatpush.msra.mxu0 %v386_v46  ;;  %435 = vmatpush.msra.mxu1 %v402_v47 }
  0x32   : > { %308 = vmatpush.msrb.mxu2 %v224_v30  ;;  %328 = vmatpush.msrb.mxu3 %v225_v31 }
  0x33   : > { %416 = vmatpush.msra.mxu0 %v385_v48  ;;  %436 = vmatpush.msra.mxu1 %v401_v49 }
  0x34   : > { %309 = vmatpush.msrb.mxu2 %v220_v32  ;;  %329 = vmatpush.msrb.mxu3 %v221_v33 }
  0x35   : > { %557 = vmatmul.msk.f32.vlgmr.msrb.gmra.mxu2 %vm250_vm1, %v217_v17  ;;  %558 = vmatmul.msk.f32.vlgmr.msrb.gmra.mxu3 %vm250_vm1, %v217_v17 }
  0x36   : > { %417 = vmatpush.msra.mxu0 %v384_v50  ;;  %437 = vmatpush.msra.mxu1 %v400_v51 }
  0x38   : > { %418 = vmatpush.msra.mxu0 %v383_v52  ;;  %438 = vmatpush.msra.mxu1 %v399_v53 }
  0x3a   : > { %419 = vmatpush.msra.mxu0 %v382_v54  ;;  %439 = vmatpush.msra.mxu1 %v398_v55 }
  0x3c   : > { %420 = vmatpush.msra.mxu0 %v381_v56  ;;  %440 = vmatpush.msra.mxu1 %v397_v57 }
  0x3e   : > { %421 = vmatpush.msra.mxu0 %v380_v58  ;;  %441 = vmatpush.msra.mxu1 %v396_v59 }
  0x40   : > { %422 = vmatpush.msra.mxu0 %v379_v60  ;;  %442 = vmatpush.msra.mxu1 %v395_v61 }
  0x42   : > { %423 = vmatpush.msra.mxu0 %v378_v62  ;;  %443 = vmatpush.msra.mxu1 %v394_v63 }
  0x44   : > { %424 = vmatpush.msra.mxu0 %v377_v2  ;;  %444 = vmatpush.msra.mxu1 %v393_v3 }
  0xa8   : > { %v271_v0 = vpop.f32.mrf.mxu2  ;;  %v291_v1 = vpop.f32.mrf.mxu3 }
  0xa9   : > { %v559_v4 = vmul.f32 -1.442695, %v271_v0  ;;  %v560_v5 = vmul.f32 -1.442695, %v291_v1 }
  0xab   : > { %600 = vpow2.f32 %v559_v4 }
  0xac   : > { %602 = vpow2.f32 %v560_v5 }
  0xb1   : > { %v601_v6 = vpop.eup %600 }
  0xb2   : > { %v603_v7 = vpop.eup %602  ;;  %v340_v8 = vadd.f32 1.0, %v601_v6 }
  0xb3   : > { %v341_v9 = vadd.f32 1.0, %v603_v7 }
  0xb4   : > { %604 = vrcp.f32 %v340_v8  ;;  %v353_v15 = vand.u32 2147483648, %v340_v8  ;;  %v351_v18 = vand.u32 2147483647, %v340_v8  ;;  %vm347_vm4 = vweird.f32 %v340_v8 }
  0xb5   : > { %606 = vrcp.f32 %v341_v9  ;;  %v368_v19 = vand.u32 2147483648, %v341_v9  ;;  %v366_v21 = vand.u32 2147483647, %v341_v9  ;;  %vm362_vm6 = vweird.f32 %v341_v9 }
  0xb6   : > { %v354_v23 = vor.u32 1.1754944e-38, %v353_v15  ;;  %vm352_vm7 = vcmp.eq.f32.partialorder %v351_v18, 8.507059e+37 }
  0xb7   : > { %v369_v26 = vor.u32 1.1754944e-38, %v368_v19  ;;  %vm367_vm9 = vcmp.eq.f32.partialorder %v366_v21, 8.507059e+37 }
  0xb8   : > { %v311_v29 = vpop.f32.mrf.mxu2  ;;  %v331_v32 = vpop.f32.mrf.mxu3 }
  0xba   : > { %v605_v10 = vpop.eup %604 }
  0xbb   : > { %v607_v11 = vpop.eup %606  ;;  %v343_v12 = vmul.f32 %v605_v10, %v340_v8  ;;  %vm348_vm2 = vweird.f32 %v605_v10 }
  0xbc   : > { %v358_v13 = vmul.f32 %v607_v11, %v341_v9  ;;  %vm363_vm3 = vweird.f32 %v607_v11  ;;  %vm349_vm5 = vmor %vm347_vm4, %vm348_vm2 }
  0xbd   : > { %v344_v14 = vsub.f32 1.0, %v343_v12  ;;  %vm364_vm8 = vmor %vm362_vm6, %vm363_vm3 }
  0xbe   : > { %v359_v16 = vsub.f32 1.0, %v358_v13 }
  0xbf   : > { %v345_v17 = vmul.f32 %v605_v10, %v344_v14 }
  0xc0   : > { %v360_v20 = vmul.f32 %v607_v11, %v359_v16 }
  0xc1   : > { %v346_v22 = vadd.f32 %v605_v10, %v345_v17 }
  0xc2   : > { %v361_v24 = vadd.f32 %v607_v11, %v360_v20 }
  0xc3   : > { %v350_v25 = vsel %vm349_vm5, %v605_v10, %v346_v22 }
  0xc4   : > { %v355_v27 = vsel %vm352_vm7, %v354_v23, %v350_v25  ;;  %v365_v28 = vsel %vm364_vm8, %v607_v11, %v361_v24 }
  0xc5   : > { %v372_v30 = vmul.f32 %v355_v27, %v271_v0  ;;  %v370_v31 = vsel %vm367_vm9, %v369_v26, %v365_v28 }
  0xc6   : > { %v373_v33 = vmul.f32 %v370_v31, %v291_v1 }
  0xc7   : > { %v374_v34 = vmul.f32 %v372_v30, %v311_v29 }
  0xc8   : > { %v375_v35 = vmul.f32 %v373_v33, %v331_v32 }
  0xc9   : > { %425 = vmatmul.f32.vlgmr.msra.gmra.mxu0 %v374_v34 }
  0xca   : > { %445 = vmatmul.f32.vlgmr.msra.gmra.mxu1 %v375_v35 }
 0x146   : > { %v426_v36 = vpop.f32.mrf.mxu0 }
 0x147   : > { %v446_v38 = vpop.f32.mrf.mxu1 }
 0x148   : > { %v447_v39 = vadd.f32 %v446_v38, %v426_v36  ;;  %454 = sbr.rel (%p561_p6) target bundleno = 341 (0x155), region = 40 }
 0x14a   : > { %v449_v40 = vadd.f32 %v447_v39, %v376_v37 }
 0x14c   : > { %450 = vst.msk [vmem:[#allocation2] sm:$0xff] %vm250_vm1, %v449_v40 }
 0x153   : > { %v455_v41 = vld [vmem:[#allocation2] sm:$0xff] }
 0x154   : > { %456 = vst.msk [vmem:[#allocation3] sm:$0xff] %vm250_vm1, %v455_v41 }
 0x155 PF: > { %p572_p7 = scmp.eq.s32.totalorder %s545_s15, 1  ;;  %s467_s29 = sshll.u32 %s811_s3, 4  ;;  %s468_s29 = int_to_ptr.hbm [resolvable:$true] %s467_s29 }
 0x156   : > { %s665_s30 = smov [#allocation3]  }
 0x157   : > { %s465_s4 = sshll.u32 %s665_s30, 4  ;;  %s466_s4 = int_to_ptr.vmem [resolvable:$true] %s465_s4 }
 0x158   : > { %569 = dma.vmem_to_hbm [thread:$0]  (%p572_p7), %s466_s4, 128, %s468_s29, [#allocation4]  }
 0x159   : > { %649 = dma.done.wait (%p572_p7), [#allocation4], 128  }
 0x15a   : > { %651 = vsyncadd (%p572_p7), [#allocation4], 4294967168 }
 0x15b PF: > { %s14_s14 = sadd.s32 1, %s662_s14   ;;  %s812_s12 = smov %s658_s13 }
 0x15c   : > { %p11_p8 = scmp.ge.s32.totalorder %s14_s14, 4   ;;  %s813_s13 = smov %s815_s16 }
 0x15e   :  { %13 = sbr.rel (!%p11_p8) target bundleno = 2 (0x2), region = 74 }
 0x163   :  { %481 = vsyncpa [#allocation4], 1 }
 0x164   :  { %483 = vsyncpa [#allocation4 + $0x1], 1 }

</bundles_post_ra>
